<compile_context>
chip_gen: v7x
topology: tpu7x:2x2x1
jax: 0.10.0
libtpu: 0.0.40
codegen_flags: <defaults>
</compile_context>

<pallas_src>
import numpy as np
import jax
import jax.numpy as jnp
from jax import lax
from jax.experimental import pallas as pl
from jax.experimental.pallas import tpu as pltpu

# ---------------- model / layout constants ----------------
N_NODES = 16            # nodes in one batched graph (no padding rows!)
G = 2                   # graphs per batch
G_PAD = 8               # graph dim padded to a sublane multiple
F_IN = 8                # input node feature dim
N_LAYERS = 2            # GIN layers
DIM = 16                # per-layer hidden dim
EMB = N_LAYERS * DIM    # 32 = concatenated embedding dim
NUM_TASKS = 1           # fc2 output (mode='regression')
BN_EPS = 1e-5           # torch BatchNorm1d default
LANES = 128
NUM_BATCHES = 8         # independent graph batches behind the grid

# data slab rows (bf16): A_hat = A + I, node features x, pooling matrix P
DR_A, DR_X, DR_P = 0, 16, 32
D_ROWS = 48

# weight slab rows (bf16, stored (in, out)); every section start is 16-aligned
R_G0W1, R_G0W2 = 0, 16
R_G1W1, R_G1W2 = 32, 48          # g1w2 output columns live on lanes 16:32
R_GW1, R_GW2 = 64, 96            # [gd.W1|fc1|gd.skip] (32 rows), [gd.W2 ; fc2] (64 rows)
R_LW1, R_LW2 = 160, 192          # [ld.W1|ld.skip] (32 rows), ld.W2 (32 rows, out lanes 32:64)
W_ROWS = 224

# bias slab rows (f32, pre-replicated across their broadcast rows)
BR_G0B1, BR_G0B2 = 0, 16
BR_G1B1, BR_G1B2 = 32, 48        # g1b2 lives on lanes 16:32
BR_GB1, BR_GB2 = 64, 72          # [gd.b1|fc1.b|gd.bs], [gd.b2@64:96 | fc2.b@96]
BR_LB1, BR_LB2 = 80, 96          # [ld.b1|ld.bs], ld.b2@32:64
BR_BN0G, BR_BN0B, BR_BN1G, BR_BN1B = 112, 113, 114, 115
B_ROWS = 120

# output slab (f32): rows 0:8 per-graph (global_d(out) @ lanes 64:96, pred @ lane 96),
#                    rows 8:24 per-node (local_d(M) @ lanes 32:64)
OR_G, OR_L = 0, 8
OUT_ROWS = 24
L_LENC, L_GENC, L_PRED = EMB, 2 * EMB, 3 * EMB   # 32, 64, 96


def infograph_star_kernel(data_ref, w_ref, b_ref, out_ref):
    # graph data (bf16; A_hat and P are exact 0/1 in bf16)
    A = data_ref[DR_A:DR_A + N_NODES, 0:N_NODES]            # (16, 16)
    x = data_ref[DR_X:DR_X + N_NODES, 0:F_IN]               # (16, 8)
    Pm = data_ref[DR_P:DR_P + G_PAD, 0:N_NODES]             # (8, 16)

    def batch_norm(z, gamma, beta):
        # training-mode BatchNorm1d over the node axis (no padding rows);
        # centered variance avoids E[z^2] - mu^2 cancellation going negative.
        mu = jnp.mean(z, axis=0, keepdims=True)
        zc = z - mu
        var = jnp.mean(zc * zc, axis=0, keepdims=True)
        return zc * (gamma * lax.rsqrt(var + BN_EPS)) + beta

    # ---------------- GIN layer 0: h0 on lanes 0:16 ----------------
    agg = jnp.dot(A, x, preferred_element_type=jnp.float32)                     # (16, 8)
    z = jnp.dot(agg.astype(jnp.bfloat16), w_ref[R_G0W1:R_G0W1 + F_IN, 0:DIM],
                preferred_element_type=jnp.float32)
    z = jnp.maximum(z + b_ref[BR_G0B1:BR_G0B1 + N_NODES, 0:DIM], 0.0)
    z = jnp.dot(z.astype(jnp.bfloat16), w_ref[R_G0W2:R_G0W2 + DIM, :],
                preferred_element_type=jnp.float32)
    z = jnp.maximum(z + b_ref[BR_G0B2:BR_G0B2 + N_NODES, :], 0.0)               # (16, 128)
    h0 = batch_norm(z, b_ref[BR_BN0G:BR_BN0G + 1, :], b_ref[BR_BN0B:BR_BN0B + 1, :])
    h0b = h0.astype(jnp.bfloat16)

    # ---------------- GIN layer 1: h1 on lanes 16:32 ----------------
    agg = jnp.dot(A, h0b, preferred_element_type=jnp.float32)                   # (16, 128)
    z = jnp.dot(agg[:, 0:DIM].astype(jnp.bfloat16), w_ref[R_G1W1:R_G1W1 + DIM, 0:DIM],
                preferred_element_type=jnp.float32)
    z = jnp.maximum(z + b_ref[BR_G1B1:BR_G1B1 + N_NODES, 0:DIM], 0.0)
    z = jnp.dot(z.astype(jnp.bfloat16), w_ref[R_G1W2:R_G1W2 + DIM, :],          # out lanes 16:32
                preferred_element_type=jnp.float32)
    z = jnp.maximum(z + b_ref[BR_G1B2:BR_G1B2 + N_NODES, :], 0.0)               # (16, 128)
    h1 = batch_norm(z, b_ref[BR_BN1G:BR_BN1G + 1, :], b_ref[BR_BN1B:BR_BN1B + 1, :])

    # M = [h0 | h1]: lane-disjoint add (no concat); out = [y0 | y1] via one pool
    Mb = (h0 + h1).astype(jnp.bfloat16)                                         # (16,128), lanes 0:32
    Y = jnp.dot(Pm, Mb, preferred_element_type=jnp.float32)                     # (8, 128), lanes 0:32

    lane_g = lax.broadcasted_iota(jnp.int32, (G_PAD, LANES), 1)
    lane_n = lax.broadcasted_iota(jnp.int32, (N_NODES, LANES), 1)

    # ------ graph heads: global_d(out) and pred = fc2(relu(fc1(out))) ------
    # one dot -> [global_d hidden | fc1 hidden | global_d skip] on lanes [0:32|32:64|64:96]
    gb = jnp.dot(Y[:, 0:EMB].astype(jnp.bfloat16), w_ref[R_GW1:R_GW1 + EMB, :],
                 preferred_element_type=jnp.float32)
    gb = gb + b_ref[BR_GB1:BR_GB1 + G_PAD, :]
    gb = jnp.where(lane_g < 2 * EMB, jnp.maximum(gb, 0.0), gb)                  # skip lanes not clipped
    # one block-structured dot -> global_d 2nd layer (lanes 64:96) and fc2/pred (lane 96)
    g2 = jnp.dot(gb[:, 0:2 * EMB].astype(jnp.bfloat16), w_ref[R_GW2:R_GW2 + 2 * EMB, :],
                 preferred_element_type=jnp.float32)
    g2 = g2 + b_ref[BR_GB2:BR_GB2 + G_PAD, :]
    genc_lanes = (lane_g >= L_GENC) & (lane_g < L_PRED)
    g2 = jnp.where(genc_lanes, jnp.maximum(g2, 0.0), g2)                        # relu(W2 h + b2); pred unclipped
    g_out = g2 + jnp.where(genc_lanes, gb, 0.0)                                 # + skip projection

    # ------------------------ node head: local_d(M) ------------------------
    lb = jnp.dot(Mb[:, 0:EMB], w_ref[R_LW1:R_LW1 + EMB, :],
                 preferred_element_type=jnp.float32)
    lb = lb + b_ref[BR_LB1:BR_LB1 + N_NODES, :]
    lb = jnp.where(lane_n < EMB, jnp.maximum(lb, 0.0), lb)
    l2 = jnp.dot(lb[:, 0:EMB].astype(jnp.bfloat16), w_ref[R_LW2:R_LW2 + EMB, :],
                 preferred_element_type=jnp.float32)
    l2 = l2 + b_ref[BR_LB2:BR_LB2 + N_NODES, :]
    lenc_lanes = (lane_n >= L_LENC) & (lane_n < L_GENC)
    l2 = jnp.where(lenc_lanes, jnp.maximum(l2, 0.0), l2)
    l_out = l2 + jnp.where(lenc_lanes, lb, 0.0)

    # lane-dense output slab: full-width, sublane-aligned stores
    out_ref[OR_G:OR_G + G_PAD, :] = g_out     # lanes 64:96 = global_d(out), lane 96 = pred
    out_ref[OR_L:OR_L + N_NODES, :] = l_out   # lanes 32:64 = local_d(M)


def infograph_star_forward(data_slabs, w_slab, b_slab):
    num_batches = data_slabs.shape[0]
    return pl.pallas_call(
        infograph_star_kernel,
        out_shape=jax.ShapeDtypeStruct((num_batches, OUT_ROWS, LANES), jnp.float32),
        grid=(num_batches,),
        in_specs=[
            pl.BlockSpec((None, D_ROWS, LANES), lambda i: (i, 0, 0)),   # data: streamed per step
            pl.BlockSpec((W_ROWS, LANES), lambda i: (0, 0)),            # weights: VMEM-resident
            pl.BlockSpec((B_ROWS, LANES), lambda i: (0, 0)),            # biases: VMEM-resident
        ],
        out_specs=pl.BlockSpec((None, OUT_ROWS, LANES), lambda i: (i, 0, 0)),
        compiler_params=pltpu.CompilerParams(
            dimension_semantics=("parallel",)),                          # v7x: split over 2 TCs
    )(data_slabs, w_slab, b_slab)


# ---------------- deterministic parameter init + slab packing ----------------
def _init_params(key):
    """Logical parameters; weights stored (in, out) == torch Linear weight.T."""
    def dense(k, fi, fo):
        return np.asarray(jax.random.normal(k, (fi, fo), jnp.float32)) / np.sqrt(fi)

    ks = iter(jax.random.split(key, 16))
    p = {}
    # GIN layer 0 / 1 (Lin -> ReLU -> Lin, then BatchNorm1d)
    p['g0w1'] = dense(next(ks), F_IN, DIM); p['g0b1'] = np.zeros(DIM, np.float32)
    p['g0w2'] = dense(next(ks), DIM, DIM);  p['g0b2'] = np.zeros(DIM, np.float32)
    p['bn0g'] = np.ones(DIM, np.float32);   p['bn0b'] = np.zeros(DIM, np.float32)
    p['g1w1'] = dense(next(ks), DIM, DIM);  p['g1b1'] = np.zeros(DIM, np.float32)
    p['g1w2'] = dense(next(ks), DIM, DIM);  p['g1b2'] = np.zeros(DIM, np.float32)
    p['bn1g'] = np.ones(DIM, np.float32);   p['bn1b'] = np.zeros(DIM, np.float32)
    # global_d / local_d skip-connected MLP heads
    for name in ('gd', 'ld'):
        p[name + 'w1'] = dense(next(ks), EMB, EMB); p[name + 'b1'] = np.zeros(EMB, np.float32)
        p[name + 'w2'] = dense(next(ks), EMB, EMB); p[name + 'b2'] = np.zeros(EMB, np.float32)
        p[name + 'ws'] = dense(next(ks), EMB, EMB); p[name + 'bs'] = np.zeros(EMB, np.float32)
    # InfoGraphStar supervised head
    p['fc1w'] = dense(next(ks), EMB, EMB);       p['fc1b'] = np.zeros(EMB, np.float32)
    p['fc2w'] = dense(next(ks), EMB, NUM_TASKS); p['fc2b'] = np.zeros(NUM_TASKS, np.float32)
    return p


def _pack_params(p):
    w = np.zeros((W_ROWS, LANES), np.float32)

    def put_w(row, col, arr):
        w[row:row + arr.shape[0], col:col + arr.shape[1]] = arr

    put_w(R_G0W1, 0, p['g0w1'])
    put_w(R_G0W2, 0, p['g0w2'])
    put_w(R_G1W1, 0, p['g1w1'])
    put_w(R_G1W2, DIM, p['g1w2'])                  # layer-1 output lane-packed to 16:32
    # global first-layer co-pack: [global_d.W1 | fc1 | global_d.skip] on lanes [0:32|32:64|64:96]
    put_w(R_GW1, 0, p['gdw1'])
    put_w(R_GW1, EMB, p['fc1w'])
    put_w(R_GW1, 2 * EMB, p['gdws'])
    # global second-layer block: rows 0:32 -> global_d.W2 (out lanes 64:96),
    #                            rows 32:64 -> fc2 (out lane 96)
    put_w(R_GW2, 2 * EMB, p['gdw2'])
    put_w(R_GW2 + EMB, 3 * EMB, p['fc2w'])
    # local head: [local_d.W1 | local_d.skip] on lanes [0:32|32:64]; W2 out lanes 32:64
    put_w(R_LW1, 0, p['ldw1'])
    put_w(R_LW1, EMB, p['ldws'])
    put_w(R_LW2, EMB, p['ldw2'])

    b = np.zeros((B_ROWS, LANES), np.float32)

    def put_b(row, col, vec, rows):
        b[row:row + rows, col:col + vec.shape[0]] = np.broadcast_to(vec, (rows, vec.shape[0]))

    put_b(BR_G0B1, 0, p['g0b1'], N_NODES)
    put_b(BR_G0B2, 0, p['g0b2'], N_NODES)
    put_b(BR_G1B1, 0, p['g1b1'], N_NODES)
    put_b(BR_G1B2, DIM, p['g1b2'], N_NODES)        # lanes 16:32, matching h1
    put_b(BR_GB1, 0, p['gdb1'], G_PAD)
    put_b(BR_GB1, EMB, p['fc1b'], G_PAD)
    put_b(BR_GB1, 2 * EMB, p['gdbs'], G_PAD)
    put_b(BR_GB2, 2 * EMB, p['gdb2'], G_PAD)
    put_b(BR_GB2, 3 * EMB, p['fc2b'], G_PAD)
    put_b(BR_LB1, 0, p['ldb1'], N_NODES)
    put_b(BR_LB1, EMB, p['ldbs'], N_NODES)
    put_b(BR_LB2, EMB, p['ldb2'], N_NODES)
    # BatchNorm affine params (single rows; layer-1 lane-packed to 16:32)
    b[BR_BN0G, 0:DIM] = p['bn0g']; b[BR_BN0B, 0:DIM] = p['bn0b']
    b[BR_BN1G, DIM:2 * DIM] = p['bn1g']; b[BR_BN1B, DIM:2 * DIM] = p['bn1b']

    return jnp.asarray(w, jnp.bfloat16), jnp.asarray(b, jnp.float32)


def _make_graph_batches(key, num_batches):
    # each batch: two graphs (nodes [0,7) and [7,16)), undirected rings; the
    # GIN self-loop is folded into the adjacency (A_hat = A + I); the slab is
    # stored in bf16 (A_hat/P exact 0/1; x was cast to bf16 in-kernel before).
    segments = [(0, 7), (7, 16)]
    adj = np.eye(N_NODES, dtype=np.float32)
    pool = np.zeros((G_PAD, N_NODES), np.float32)
    for g, (s, e) in enumerate(segments):
        pool[g, s:e] = 1.0
        for i in range(s, e):
            j = s + ((i - s + 1) % (e - s))
            adj[i, j] = 1.0
            adj[j, i] = 1.0
    x = np.asarray(jax.random.normal(key, (num_batches, N_NODES, F_IN), jnp.float32))

    data = np.zeros((num_batches, D_ROWS, LANES), np.float32)
    data[:, DR_A:DR_A + N_NODES, :N_NODES] = adj
    data[:, DR_X:DR_X + N_NODES, :F_IN] = x
    data[:, DR_P:DR_P + G_PAD, :N_NODES] = pool
    return jnp.asarray(data, jnp.bfloat16)


if __name__ == "__main__":
    key = jax.random.PRNGKey(0)
    k_data, k_param = jax.random.split(key)
    data_slabs = _make_graph_batches(k_data, NUM_BATCHES)
    w_slab, b_slab = _pack_params(_init_params(k_param))

    out = infograph_star_forward(data_slabs, w_slab, b_slab)
    jax.block_until_ready(out)

    # host-side views of the packed, lane-dense result (no extra XLA slice ops)
    o = np.asarray(out)                                            # (B, 24, 128)
    pred = o[:, OR_G:OR_G + G, L_PRED:L_PRED + NUM_TASKS]          # forward() output
    g_enc = o[:, OR_G:OR_G + G, L_GENC:L_GENC + EMB]               # global_d(out)
    l_enc = o[:, OR_L:OR_L + N_NODES, L_LENC:L_LENC + EMB]         # local_d(M)

    assert pred.shape == (NUM_BATCHES, G, NUM_TASKS)
    assert g_enc.shape == (NUM_BATCHES, G, EMB)
    assert l_enc.shape == (NUM_BATCHES, N_NODES, EMB)
    assert np.all(np.isfinite(o))
    # data-dependence sanity: different batches give different embeddings
    assert not np.allclose(l_enc[0], l_enc[1])
    print("KERNEL_OK")
</pallas_src>

<mosaic_0001>
module attributes {stable_mosaic.version = 11 : i64} {
  func.func @infograph_star_kernel(%arg0: i32, %arg1: memref<1x48x128xbf16, #tpu.memory_space<vmem>>, %arg2: memref<224x128xbf16, #tpu.memory_space<vmem>>, %arg3: memref<120x128xf32, #tpu.memory_space<vmem>>, %arg4: memref<1x24x128xf32, #tpu.memory_space<vmem>>) attributes {dimension_semantics = [#tpu.dimension_semantics<parallel>], iteration_bounds = array<i64: 8>, scalar_prefetch = 0 : i64, scratch_operands = 0 : i64, tpu.core_type = #tpu.core_type<tc>, window_params = [{transform_indices = @transform_0, window_bounds = array<i64: 1, 48, 128>}, {pipeline_mode = #tpu.pipeline_mode<synchronous>, transform_indices = @transform_1, window_bounds = array<i64: 224, 128>}, {pipeline_mode = #tpu.pipeline_mode<synchronous>, transform_indices = @transform_2, window_bounds = array<i64: 120, 128>}, {transform_indices = @transform_3, window_bounds = array<i64: 1, 24, 128>}]} {
    %c0 = arith.constant 0 : index
    %c0_0 = arith.constant 0 : index
    %c0_1 = arith.constant 0 : index
    %0 = vector.load %arg1[%c0, %c0_0, %c0_1] : memref<1x48x128xbf16, #tpu.memory_space<vmem>>, vector<1x16x16xbf16>
    %1 = vector.shape_cast %0 : vector<1x16x16xbf16> to vector<16x16xbf16>
    %c0_2 = arith.constant 0 : index
    %c16 = arith.constant 16 : index
    %c0_3 = arith.constant 0 : index
    %2 = vector.load %arg1[%c0_2, %c16, %c0_3] : memref<1x48x128xbf16, #tpu.memory_space<vmem>>, vector<1x16x8xbf16>
    %3 = vector.shape_cast %2 : vector<1x16x8xbf16> to vector<16x8xbf16>
    %c0_4 = arith.constant 0 : index
    %c32 = arith.constant 32 : index
    %c0_5 = arith.constant 0 : index
    %4 = vector.load %arg1[%c0_4, %c32, %c0_5] : memref<1x48x128xbf16, #tpu.memory_space<vmem>>, vector<1x8x16xbf16>
    %5 = vector.shape_cast %4 : vector<1x8x16xbf16> to vector<8x16xbf16>
    %cst = arith.constant dense<0.000000e+00> : vector<16x8xf32>
    %6 = tpu.matmul %1, %3, %cst {dimension_numbers = #tpu.dot_dimension_numbers<[1], [0], [0], [1], [0, 0, 1, 1], [], []>} : vector<16x16xbf16>, vector<16x8xbf16>, vector<16x8xf32> -> vector<16x8xf32>
    %7 = arith.truncf %6 : vector<16x8xf32> to vector<16x8xbf16>
    %c0_6 = arith.constant 0 : index
    %c0_7 = arith.constant 0 : index
    %8 = vector.load %arg2[%c0_6, %c0_7] : memref<224x128xbf16, #tpu.memory_space<vmem>>, vector<8x16xbf16>
    %cst_8 = arith.constant dense<0.000000e+00> : vector<16x16xf32>
    %9 = tpu.matmul %7, %8, %cst_8 {dimension_numbers = #tpu.dot_dimension_numbers<[1], [0], [0], [1], [0, 0, 1, 1], [], []>} : vector<16x8xbf16>, vector<8x16xbf16>, vector<16x16xf32> -> vector<16x16xf32>
    %c0_9 = arith.constant 0 : index
    %c0_10 = arith.constant 0 : index
    %10 = vector.load %arg3[%c0_9, %c0_10] : memref<120x128xf32, #tpu.memory_space<vmem>>, vector<16x16xf32>
    %11 = arith.addf %9, %10 : vector<16x16xf32>
    %cst_11 = arith.constant 0.000000e+00 : f32
    %12 = vector.broadcast %cst_11 : f32 to vector<16x16xf32>
    %13 = arith.maximumf %11, %12 : vector<16x16xf32>
    %14 = arith.truncf %13 : vector<16x16xf32> to vector<16x16xbf16>
    %c16_12 = arith.constant 16 : index
    %c0_13 = arith.constant 0 : index
    %15 = vector.load %arg2[%c16_12, %c0_13] : memref<224x128xbf16, #tpu.memory_space<vmem>>, vector<16x128xbf16>
    %cst_14 = arith.constant dense<0.000000e+00> : vector<16x128xf32>
    %16 = tpu.matmul %14, %15, %cst_14 {dimension_numbers = #tpu.dot_dimension_numbers<[1], [0], [0], [1], [0, 0, 1, 1], [], []>} : vector<16x16xbf16>, vector<16x128xbf16>, vector<16x128xf32> -> vector<16x128xf32>
    %c16_15 = arith.constant 16 : index
    %c0_16 = arith.constant 0 : index
    %17 = vector.load %arg3[%c16_15, %c0_16] : memref<120x128xf32, #tpu.memory_space<vmem>>, vector<16x128xf32>
    %18 = arith.addf %16, %17 : vector<16x128xf32>
    %cst_17 = arith.constant 0.000000e+00 : f32
    %19 = vector.broadcast %cst_17 : f32 to vector<16x128xf32>
    %20 = arith.maximumf %18, %19 : vector<16x128xf32>
    %c112 = arith.constant 112 : index
    %c0_18 = arith.constant 0 : index
    %21 = vector.load %arg3[%c112, %c0_18] : memref<120x128xf32, #tpu.memory_space<vmem>>, vector<1x128xf32>
    %c113 = arith.constant 113 : index
    %c0_19 = arith.constant 0 : index
    %22 = vector.load %arg3[%c113, %c0_19] : memref<120x128xf32, #tpu.memory_space<vmem>>, vector<1x128xf32>
    %cst_20 = arith.constant dense<0.000000e+00> : vector<128xf32>
    %23 = vector.multi_reduction <add>, %20, %cst_20 [0] : vector<16x128xf32> to vector<128xf32>
    %24 = vector.shape_cast %23 : vector<128xf32> to vector<1x128xf32>
    %cst_21 = arith.constant 1.600000e+01 : f32
    %25 = vector.broadcast %cst_21 : f32 to vector<1x128xf32>
    %26 = arith.divf %24, %25 : vector<1x128xf32>
    %27 = vector.broadcast %26 : vector<1x128xf32> to vector<16x128xf32>
    %28 = arith.subf %20, %27 : vector<16x128xf32>
    %29 = arith.mulf %28, %28 : vector<16x128xf32>
    %cst_22 = arith.constant dense<0.000000e+00> : vector<128xf32>
    %30 = vector.multi_reduction <add>, %29, %cst_22 [0] : vector<16x128xf32> to vector<128xf32>
    %31 = vector.shape_cast %30 : vector<128xf32> to vector<1x128xf32>
    %cst_23 = arith.constant 1.600000e+01 : f32
    %32 = vector.broadcast %cst_23 : f32 to vector<1x128xf32>
    %33 = arith.divf %31, %32 : vector<1x128xf32>
    %cst_24 = arith.constant 9.99999974E-6 : f32
    %34 = vector.broadcast %cst_24 : f32 to vector<1x128xf32>
    %35 = arith.addf %33, %34 : vector<1x128xf32>
    %36 = math.rsqrt %35 : vector<1x128xf32>
    %37 = arith.mulf %21, %36 : vector<1x128xf32>
    %38 = vector.broadcast %37 : vector<1x128xf32> to vector<16x128xf32>
    %39 = arith.mulf %28, %38 : vector<16x128xf32>
    %40 = vector.broadcast %22 : vector<1x128xf32> to vector<16x128xf32>
    %41 = arith.addf %39, %40 : vector<16x128xf32>
    %42 = arith.truncf %41 : vector<16x128xf32> to vector<16x128xbf16>
    %cst_25 = arith.constant dense<0.000000e+00> : vector<16x128xf32>
    %43 = tpu.matmul %1, %42, %cst_25 {dimension_numbers = #tpu.dot_dimension_numbers<[1], [0], [0], [1], [0, 0, 1, 1], [], []>} : vector<16x16xbf16>, vector<16x128xbf16>, vector<16x128xf32> -> vector<16x128xf32>
    %44 = vector.extract_strided_slice %43 {offsets = [0, 0], sizes = [16, 16], strides = [1, 1]} : vector<16x128xf32> to vector<16x16xf32>
    %45 = arith.truncf %44 : vector<16x16xf32> to vector<16x16xbf16>
    %c32_26 = arith.constant 32 : index
    %c0_27 = arith.constant 0 : index
    %46 = vector.load %arg2[%c32_26, %c0_27] : memref<224x128xbf16, #tpu.memory_space<vmem>>, vector<16x16xbf16>
    %cst_28 = arith.constant dense<0.000000e+00> : vector<16x16xf32>
    %47 = tpu.matmul %45, %46, %cst_28 {dimension_numbers = #tpu.dot_dimension_numbers<[1], [0], [0], [1], [0, 0, 1, 1], [], []>} : vector<16x16xbf16>, vector<16x16xbf16>, vector<16x16xf32> -> vector<16x16xf32>
    %c32_29 = arith.constant 32 : index
    %c0_30 = arith.constant 0 : index
    %48 = vector.load %arg3[%c32_29, %c0_30] : memref<120x128xf32, #tpu.memory_space<vmem>>, vector<16x16xf32>
    %49 = arith.addf %47, %48 : vector<16x16xf32>
    %cst_31 = arith.constant 0.000000e+00 : f32
    %50 = vector.broadcast %cst_31 : f32 to vector<16x16xf32>
    %51 = arith.maximumf %49, %50 : vector<16x16xf32>
    %52 = arith.truncf %51 : vector<16x16xf32> to vector<16x16xbf16>
    %c48 = arith.constant 48 : index
    %c0_32 = arith.constant 0 : index
    %53 = vector.load %arg2[%c48, %c0_32] : memref<224x128xbf16, #tpu.memory_space<vmem>>, vector<16x128xbf16>
    %cst_33 = arith.constant dense<0.000000e+00> : vector<16x128xf32>
    %54 = tpu.matmul %52, %53, %cst_33 {dimension_numbers = #tpu.dot_dimension_numbers<[1], [0], [0], [1], [0, 0, 1, 1], [], []>} : vector<16x16xbf16>, vector<16x128xbf16>, vector<16x128xf32> -> vector<16x128xf32>
    %c48_34 = arith.constant 48 : index
    %c0_35 = arith.constant 0 : index
    %55 = vector.load %arg3[%c48_34, %c0_35] : memref<120x128xf32, #tpu.memory_space<vmem>>, vector<16x128xf32>
    %56 = arith.addf %54, %55 : vector<16x128xf32>
    %cst_36 = arith.constant 0.000000e+00 : f32
    %57 = vector.broadcast %cst_36 : f32 to vector<16x128xf32>
    %58 = arith.maximumf %56, %57 : vector<16x128xf32>
    %c114 = arith.constant 114 : index
    %c0_37 = arith.constant 0 : index
    %59 = vector.load %arg3[%c114, %c0_37] : memref<120x128xf32, #tpu.memory_space<vmem>>, vector<1x128xf32>
    %c115 = arith.constant 115 : index
    %c0_38 = arith.constant 0 : index
    %60 = vector.load %arg3[%c115, %c0_38] : memref<120x128xf32, #tpu.memory_space<vmem>>, vector<1x128xf32>
    %cst_39 = arith.constant dense<0.000000e+00> : vector<128xf32>
    %61 = vector.multi_reduction <add>, %58, %cst_39 [0] : vector<16x128xf32> to vector<128xf32>
    %62 = vector.shape_cast %61 : vector<128xf32> to vector<1x128xf32>
    %cst_40 = arith.constant 1.600000e+01 : f32
    %63 = vector.broadcast %cst_40 : f32 to vector<1x128xf32>
    %64 = arith.divf %62, %63 : vector<1x128xf32>
    %65 = vector.broadcast %64 : vector<1x128xf32> to vector<16x128xf32>
    %66 = arith.subf %58, %65 : vector<16x128xf32>
    %67 = arith.mulf %66, %66 : vector<16x128xf32>
    %cst_41 = arith.constant dense<0.000000e+00> : vector<128xf32>
    %68 = vector.multi_reduction <add>, %67, %cst_41 [0] : vector<16x128xf32> to vector<128xf32>
    %69 = vector.shape_cast %68 : vector<128xf32> to vector<1x128xf32>
    %cst_42 = arith.constant 1.600000e+01 : f32
    %70 = vector.broadcast %cst_42 : f32 to vector<1x128xf32>
    %71 = arith.divf %69, %70 : vector<1x128xf32>
    %cst_43 = arith.constant 9.99999974E-6 : f32
    %72 = vector.broadcast %cst_43 : f32 to vector<1x128xf32>
    %73 = arith.addf %71, %72 : vector<1x128xf32>
    %74 = math.rsqrt %73 : vector<1x128xf32>
    %75 = arith.mulf %59, %74 : vector<1x128xf32>
    %76 = vector.broadcast %75 : vector<1x128xf32> to vector<16x128xf32>
    %77 = arith.mulf %66, %76 : vector<16x128xf32>
    %78 = vector.broadcast %60 : vector<1x128xf32> to vector<16x128xf32>
    %79 = arith.addf %77, %78 : vector<16x128xf32>
    %80 = arith.addf %41, %79 : vector<16x128xf32>
    %81 = arith.truncf %80 : vector<16x128xf32> to vector<16x128xbf16>
    %cst_44 = arith.constant dense<0.000000e+00> : vector<8x128xf32>
    %82 = tpu.matmul %5, %81, %cst_44 {dimension_numbers = #tpu.dot_dimension_numbers<[1], [0], [0], [1], [0, 0, 1, 1], [], []>} : vector<8x16xbf16>, vector<16x128xbf16>, vector<8x128xf32> -> vector<8x128xf32>
    %83 = tpu.iota {dimensions = array<i32: 1>} : vector<8x128xi32>
    %84 = tpu.iota {dimensions = array<i32: 1>} : vector<16x128xi32>
    %85 = vector.extract_strided_slice %82 {offsets = [0, 0], sizes = [8, 32], strides = [1, 1]} : vector<8x128xf32> to vector<8x32xf32>
    %86 = arith.truncf %85 : vector<8x32xf32> to vector<8x32xbf16>
    %c64 = arith.constant 64 : index
    %c0_45 = arith.constant 0 : index
    %87 = vector.load %arg2[%c64, %c0_45] : memref<224x128xbf16, #tpu.memory_space<vmem>>, vector<32x128xbf16>
    %cst_46 = arith.constant dense<0.000000e+00> : vector<8x128xf32>
    %88 = tpu.matmul %86, %87, %cst_46 {dimension_numbers = #tpu.dot_dimension_numbers<[1], [0], [0], [1], [0, 0, 1, 1], [], []>} : vector<8x32xbf16>, vector<32x128xbf16>, vector<8x128xf32> -> vector<8x128xf32>
    %c64_47 = arith.constant 64 : index
    %c0_48 = arith.constant 0 : index
    %89 = vector.load %arg3[%c64_47, %c0_48] : memref<120x128xf32, #tpu.memory_space<vmem>>, vector<8x128xf32>
    %90 = arith.addf %88, %89 : vector<8x128xf32>
    %c64_i32 = arith.constant 64 : i32
    %91 = vector.broadcast %c64_i32 : i32 to vector<8x128xi32>
    %92 = arith.cmpi slt, %83, %91 : vector<8x128xi32>
    %cst_49 = arith.constant 0.000000e+00 : f32
    %93 = vector.broadcast %cst_49 : f32 to vector<8x128xf32>
    %94 = arith.maximumf %90, %93 : vector<8x128xf32>
    %95 = arith.select %92, %94, %90 : vector<8x128xi1>, vector<8x128xf32>
    %96 = vector.extract_strided_slice %95 {offsets = [0, 0], sizes = [8, 64], strides = [1, 1]} : vector<8x128xf32> to vector<8x64xf32>
    %97 = arith.truncf %96 : vector<8x64xf32> to vector<8x64xbf16>
    %c96 = arith.constant 96 : index
    %c0_50 = arith.constant 0 : index
    %98 = vector.load %arg2[%c96, %c0_50] : memref<224x128xbf16, #tpu.memory_space<vmem>>, vector<64x128xbf16>
    %cst_51 = arith.constant dense<0.000000e+00> : vector<8x128xf32>
    %99 = tpu.matmul %97, %98, %cst_51 {dimension_numbers = #tpu.dot_dimension_numbers<[1], [0], [0], [1], [0, 0, 1, 1], [], []>} : vector<8x64xbf16>, vector<64x128xbf16>, vector<8x128xf32> -> vector<8x128xf32>
    %c72 = arith.constant 72 : index
    %c0_52 = arith.constant 0 : index
    %100 = vector.load %arg3[%c72, %c0_52] : memref<120x128xf32, #tpu.memory_space<vmem>>, vector<8x128xf32>
    %101 = arith.addf %99, %100 : vector<8x128xf32>
    %c64_i32_53 = arith.constant 64 : i32
    %102 = vector.broadcast %c64_i32_53 : i32 to vector<8x128xi32>
    %103 = arith.cmpi sge, %83, %102 : vector<8x128xi32>
    %c96_i32 = arith.constant 96 : i32
    %104 = vector.broadcast %c96_i32 : i32 to vector<8x128xi32>
    %105 = arith.cmpi slt, %83, %104 : vector<8x128xi32>
    %106 = arith.andi %103, %105 : vector<8x128xi1>
    %cst_54 = arith.constant 0.000000e+00 : f32
    %107 = vector.broadcast %cst_54 : f32 to vector<8x128xf32>
    %108 = arith.maximumf %101, %107 : vector<8x128xf32>
    %109 = arith.select %106, %108, %101 : vector<8x128xi1>, vector<8x128xf32>
    %cst_55 = arith.constant 0.000000e+00 : f32
    %110 = vector.broadcast %cst_55 : f32 to vector<8x128xf32>
    %111 = arith.select %106, %95, %110 : vector<8x128xi1>, vector<8x128xf32>
    %112 = arith.addf %109, %111 : vector<8x128xf32>
    %113 = vector.extract_strided_slice %81 {offsets = [0, 0], sizes = [16, 32], strides = [1, 1]} : vector<16x128xbf16> to vector<16x32xbf16>
    %c160 = arith.constant 160 : index
    %c0_56 = arith.constant 0 : index
    %114 = vector.load %arg2[%c160, %c0_56] : memref<224x128xbf16, #tpu.memory_space<vmem>>, vector<32x128xbf16>
    %cst_57 = arith.constant dense<0.000000e+00> : vector<16x128xf32>
    %115 = tpu.matmul %113, %114, %cst_57 {dimension_numbers = #tpu.dot_dimension_numbers<[1], [0], [0], [1], [0, 0, 1, 1], [], []>} : vector<16x32xbf16>, vector<32x128xbf16>, vector<16x128xf32> -> vector<16x128xf32>
    %c80 = arith.constant 80 : index
    %c0_58 = arith.constant 0 : index
    %116 = vector.load %arg3[%c80, %c0_58] : memref<120x128xf32, #tpu.memory_space<vmem>>, vector<16x128xf32>
    %117 = arith.addf %115, %116 : vector<16x128xf32>
    %c32_i32 = arith.constant 32 : i32
    %118 = vector.broadcast %c32_i32 : i32 to vector<16x128xi32>
    %119 = arith.cmpi slt, %84, %118 : vector<16x128xi32>
    %cst_59 = arith.constant 0.000000e+00 : f32
    %120 = vector.broadcast %cst_59 : f32 to vector<16x128xf32>
    %121 = arith.maximumf %117, %120 : vector<16x128xf32>
    %122 = arith.select %119, %121, %117 : vector<16x128xi1>, vector<16x128xf32>
    %123 = vector.extract_strided_slice %122 {offsets = [0, 0], sizes = [16, 32], strides = [1, 1]} : vector<16x128xf32> to vector<16x32xf32>
    %124 = arith.truncf %123 : vector<16x32xf32> to vector<16x32xbf16>
    %c192 = arith.constant 192 : index
    %c0_60 = arith.constant 0 : index
    %125 = vector.load %arg2[%c192, %c0_60] : memref<224x128xbf16, #tpu.memory_space<vmem>>, vector<32x128xbf16>
    %cst_61 = arith.constant dense<0.000000e+00> : vector<16x128xf32>
    %126 = tpu.matmul %124, %125, %cst_61 {dimension_numbers = #tpu.dot_dimension_numbers<[1], [0], [0], [1], [0, 0, 1, 1], [], []>} : vector<16x32xbf16>, vector<32x128xbf16>, vector<16x128xf32> -> vector<16x128xf32>
    %c96_62 = arith.constant 96 : index
    %c0_63 = arith.constant 0 : index
    %127 = vector.load %arg3[%c96_62, %c0_63] : memref<120x128xf32, #tpu.memory_space<vmem>>, vector<16x128xf32>
    %128 = arith.addf %126, %127 : vector<16x128xf32>
    %c32_i32_64 = arith.constant 32 : i32
    %129 = vector.broadcast %c32_i32_64 : i32 to vector<16x128xi32>
    %130 = arith.cmpi sge, %84, %129 : vector<16x128xi32>
    %c64_i32_65 = arith.constant 64 : i32
    %131 = vector.broadcast %c64_i32_65 : i32 to vector<16x128xi32>
    %132 = arith.cmpi slt, %84, %131 : vector<16x128xi32>
    %133 = arith.andi %130, %132 : vector<16x128xi1>
    %cst_66 = arith.constant 0.000000e+00 : f32
    %134 = vector.broadcast %cst_66 : f32 to vector<16x128xf32>
    %135 = arith.maximumf %128, %134 : vector<16x128xf32>
    %136 = arith.select %133, %135, %128 : vector<16x128xi1>, vector<16x128xf32>
    %cst_67 = arith.constant 0.000000e+00 : f32
    %137 = vector.broadcast %cst_67 : f32 to vector<16x128xf32>
    %138 = arith.select %133, %122, %137 : vector<16x128xi1>, vector<16x128xf32>
    %139 = arith.addf %136, %138 : vector<16x128xf32>
    %c0_68 = arith.constant 0 : index
    %c0_69 = arith.constant 0 : index
    %c0_70 = arith.constant 0 : index
    %140 = vector.load %arg4[%c0_68, %c0_69, %c0_70] : memref<1x24x128xf32, #tpu.memory_space<vmem>>, vector<1x8x128xf32>
    %141 = vector.shape_cast %140 : vector<1x8x128xf32> to vector<8x128xf32>
    %142 = vector.shape_cast %112 : vector<8x128xf32> to vector<1x8x128xf32>
    tpu.vector_store %arg4[%c0_68, %c0_69, %c0_70], %142 {strides = array<i32>} : memref<1x24x128xf32, #tpu.memory_space<vmem>>, vector<1x8x128xf32>,
    %c0_71 = arith.constant 0 : index
    %c8 = arith.constant 8 : index
    %c0_72 = arith.constant 0 : index
    %143 = vector.load %arg4[%c0_71, %c8, %c0_72] : memref<1x24x128xf32, #tpu.memory_space<vmem>>, vector<1x16x128xf32>
    %144 = vector.shape_cast %143 : vector<1x16x128xf32> to vector<16x128xf32>
    %145 = vector.shape_cast %139 : vector<16x128xf32> to vector<1x16x128xf32>
    tpu.vector_store %arg4[%c0_71, %c8, %c0_72], %145 {strides = array<i32>} : memref<1x24x128xf32, #tpu.memory_space<vmem>>, vector<1x16x128xf32>,
    return
  }
  func.func @transform_0(%arg0: i32) -> (i32, i32, i32) {
    %c0_i32 = arith.constant 0 : i32
    %c0_i32_0 = arith.constant 0 : i32
    %c0_i32_1 = arith.constant 0 : i32
    return %arg0, %c0_i32, %c0_i32_0 : i32, i32, i32
  }
  func.func @transform_1(%arg0: i32) -> (i32, i32) {
    %c0_i32 = arith.constant 0 : i32
    %c0_i32_0 = arith.constant 0 : i32
    %c0_i32_1 = arith.constant 0 : i32
    return %c0_i32, %c0_i32_0 : i32, i32
  }
  func.func @transform_2(%arg0: i32) -> (i32, i32) {
    %c0_i32 = arith.constant 0 : i32
    %c0_i32_0 = arith.constant 0 : i32
    %c0_i32_1 = arith.constant 0 : i32
    return %c0_i32, %c0_i32_0 : i32, i32
  }
  func.func @transform_3(%arg0: i32) -> (i32, i32, i32) {
    %c0_i32 = arith.constant 0 : i32
    %c0_i32_0 = arith.constant 0 : i32
    %c0_i32_1 = arith.constant 0 : i32
    return %arg0, %c0_i32, %c0_i32_0 : i32, i32, i32
  }
}

</mosaic_0001>

<bundles_post_ra>
// kernel: tpu_custom_call.1
= control target key start
LH: loop header
LB: loop body
LE: loop exit
PB: predicated region body
PF: predicated region fallthrough
CT: control target
= control target key end

     0   :  { %8 = vsyncpa [#allocation3], 0  ;;  %s1835_s0 = inlined_call_operand.hbm [shape: bf16[8,48,128], index: 0, kind: input, shape index: {}]   ;;  %s1836_s1 = inlined_call_operand.hbm [shape: bf16[224,128], index: 1, kind: input, shape index: {}]   ;;  %s1837_s2 = inlined_call_operand.hbm [shape: f32[120,128], index: 2, kind: input, shape index: {}]   ;;  %s1838_s3 = inlined_call_operand.hbm [shape: f32[8,24,128], index: 3, kind: output, shape index: {}]  }
   0x1   :  { %10 = vsyncpa [#allocation3 + $0x1], 0 }
   0x2   :  { %11 = vsyncpa [#allocation6], 0 }
   0x3   :  { %12 = vsyncpa [#allocation4], 0 }
   0x4   :  { %14 = vsyncpa [#allocation4 + $0x1], 0  ;;  %s1504_s12 = smov 0   ;;  %s1506_s13 = smov 0  }
   0x5   :  { %s1508_s14 = smov 0   ;;  %s1510_s15 = smov 0  }
   0x6 LB: > { %s1525_s16 = sadd.s32 4294967295, %s1470_s15   ;;  %s1070_s17 = sadd.s32 4294967294, %s1470_s15   ;;  %s1470_s15 = sphi %s1510_s15, %s1861_s15   ;;  %s1466_s14 = sphi %s1508_s14, %s1860_s14   ;;  %s1462_s13 = sphi %s1506_s13, %s1859_s13   ;;  %s1458_s12 = sphi %s1504_s12, %s1858_s12  }
   0x7   : > { %p40_p0 = scmp.ne.s32.totalorder %s1462_s13, %s1458_s12  ;;  %p1839_p1 = scmp.eq.s32.totalorder %s1525_s16, 0 }
   0x8   : > { %p112_p3 = scmp.eq.s32.totalorder %s1070_s17, 7  ;;  %p1071_p5 = scmp.ge.s32.totalorder %s1470_s15, 1 }
   0x9   : > { %p1534_p4 = por %p1839_p1, %p40_p0  ;;  %p119_p7 = scmp.lt.s32.totalorder %s1470_s15, 9 }
   0xa   : > { %p1539_p6 = por %p112_p3, %p40_p0  ;;  %s1472_s21 = smov [#allocation5]  }
   0xb   : > { %s1842_s18 = scalar_select %p1534_p4, 1, 0 }
   0xc   : > { %s1843_s19 = scalar_select %p1539_p6, 1, 0 }
   0xd   : > { %p1544_p8 = pnand %p1071_p5, %p119_p7  ;;  %s131_s22 = sshll.u32 %s1472_s21, 4  ;;  %s132_s22 = int_to_ptr.vmem [resolvable:$true] %s131_s22 }
   0xe   : > { %s1473_s24 = smov [#allocation7]   ;;  %s1314_s28 = scalar_lea.hbm %s1836_s1, 1792 }
   0xf   : > { %s1844_s20 = scalar_select %p1544_p8, 1, 0 }
  0x10   : > { %p1232_p9 = pneg %p1544_p8  ;;  %s144_s25 = sshll.u32 %s1473_s24, 4  ;;  %s1556_s25 = int_to_ptr.vmem [resolvable:$true] %s144_s25 }
  0x11   : > { %p1315_p11 = scmp.ne.s32.totalorder %s1836_s1, %s1314_s28  ;;  %p1321_p3 = scmp.lt.u32.totalorder %s1314_s28, %s1836_s1 }
  0x12   : > { %p1552_p10 = pnand %p1232_p9, %p1839_p1 }
  0x14   : > { %p1316_p12 = pneg %p1552_p10 }
  0x16   : > { %p1317_p13 = pnand %p1316_p12, %p1315_p11 }
  0x18   : > { %p1318_p0 = pneg %p1317_p13 }
  0x1a   : > { %p1323_p5 = pnand %p1321_p3, %p1318_p0 }
  0x1c   : > { %1326 = shalt.err (!%p1323_p5)
}
  0x1d   : > { %s1327_s6 = scalar_lea.vmem %s132_s22, 1792  ;;  %p1335_p2 = scmp.lt.s32.totalorder %s132_s22, %s132_s22 }
  0x1e   : > { %p1328_p7 = scmp.ne.s32.totalorder %s132_s22, %s1327_s6  ;;  %p1336_p6 = scmp.lt.s32.totalorder %s1327_s6, %s1327_s6 }
  0x20   : > { %p1330_p9 = pnand %p1328_p7, %p1316_p12  ;;  %p1337_p4 = por %p1336_p6, %p1335_p2 }
  0x22   : > { %p1331_p1 = pneg %p1330_p9 }
  0x24   : > { %p1338_p8 = pnand %p1337_p4, %p1331_p1 }
  0x26   : > { %1341 = shalt.err (!%p1338_p8)
}
  0x27   : > { %s1474_s7 = smov 64   ;;  %s1475_s8 = smov 4  }
  0x28   : > { %1235 = dma.hbm_to_vmem [thread:$0]  (!%p1552_p10), %s1836_s1, 1792, %s132_s22, [#allocation6], %s1474_s7, %s1474_s7, %s1475_s8  }
  0x29   : > { %s1342_s21 = scalar_lea.hbm %s1837_s2, 1920 }
  0x2a   : > { %p1343_p1 = scmp.ne.s32.totalorder %s1837_s2, %s1342_s21  ;;  %p1349_p6 = scmp.lt.u32.totalorder %s1342_s21, %s1837_s2 }
  0x2c   : > { %p1345_p2 = pnand %p1343_p1, %p1316_p12 }
  0x2e   : > { %p1346_p4 = pneg %p1345_p2 }
  0x30   : > { %p1351_p8 = pnand %p1349_p6, %p1346_p4 }
  0x32   : > { %1354 = shalt.err (!%p1351_p8)
}
  0x33   : > { %s1355_s22 = scalar_lea.vmem %s1556_s25, 1920  ;;  %p1363_p3 = scmp.lt.s32.totalorder %s1556_s25, %s1556_s25 }
  0x34   : > { %p1356_p11 = scmp.ne.s32.totalorder %s1556_s25, %s1355_s22  ;;  %p1364_p5 = scmp.lt.s32.totalorder %s1355_s22, %s1355_s22 }
  0x36   : > { %p1358_p13 = pnand %p1356_p11, %p1316_p12  ;;  %p1365_p7 = por %p1364_p5, %p1363_p3 }
  0x38   : > { %p1359_p0 = pneg %p1358_p13 }
  0x3a   : > { %p1366_p9 = pnand %p1365_p7, %p1359_p0 }
  0x3c   : > { %1369 = shalt.err (!%p1366_p9)
}
  0x3d   : > { %s1476_s29 = smov 128   ;;  %s1477_s30 = smov 8  }
  0x3e   : > { %1238 = dma.hbm_to_vmem [thread:$0]  (!%p1552_p10), %s1837_s2, 1920, %s1556_s25, [#allocation6], %s1476_s29, %s1476_s29, %s1477_s30  }
  0x3f   : > { %s1609_s6 = sadd.s32 1, %s1470_s15   ;;  %s27_s10 = sadd.s32 1, %s1466_s14 }
  0x40   : > { %s24_s9 = ssub.s32 %s1470_s15, %s1609_s6  ;;  %p34_p1 = scmp.ne.s32.totalorder %s1466_s14, %s1462_s13 }
  0x41   : > { %p25_p12 = scmp.eq.s32.totalorder %s24_s9, 0  ;;  %p35_p2 = scmp.eq.s32.totalorder %s1470_s15, 0 }
  0x42   : > { %p1846_p6 = scmp.eq.s32.totalorder %s1525_s16, 7  ;;  %p1249_p11 = scmp.lt.s32.totalorder %s1470_s15, 8 }
  0x43   : > { %s1618_s11 = scalar_select %p25_p12, %s1466_s14, %s27_s10  }
  0x44   : > { %p36_p4 = por %p35_p2, %p34_p1  ;;  %p1622_p8 = por %p1846_p6, %p34_p1 }
  0x45   : > { %s158_s23 = sand.u32 1, %s1466_s14   ;;  %s1217_s25 = smul.u32 384, %s1470_s15 }
  0x46   : > { %s1216_s21 = smul.u32 24, %s158_s23  ;;  %p1629_p10 = pnand %p1249_p11, %p36_p4 }
  0x47   : > { %s1636_s28 = scalar_lea.hbm %s1835_s0, %s1217_s25  ;;  %s1640_s30 = scalar_lea.sflag [#allocation3], %s158_s23 }
  0x48   : > { %s162_s22 = scalar_lea.vmem [#allocation2], %s1216_s21  ;;  %s1370_s4 = scalar_lea.hbm %s1636_s28, 384 }
  0x49   : > { %s169_s29 = sshll.u32 %s162_s22, 4  ;;  %p1371_p13 = scmp.ne.s32.totalorder %s1636_s28, %s1370_s4  ;;  %s1638_s29 = int_to_ptr.vmem [resolvable:$true] %s169_s29 }
  0x4a   : > { %p1372_p0 = pneg %p1629_p10  ;;  %s1375_s10 = scalar_lea.hbm %s1835_s0, 3072 }
  0x4b   : > { %p1376_p7 = scmp.lt.u32.totalorder %s1636_s28, %s1835_s0  ;;  %p1377_p9 = scmp.lt.u32.totalorder %s1375_s10, %s1370_s4 }
  0x4c   : > { %p1373_p3 = pnand %p1372_p0, %p1371_p13  ;;  %p1379_p1 = scmp.lt.u32.totalorder %s1370_s4, %s1636_s28 }
  0x4d   : > { %p1378_p12 = por %p1377_p9, %p1376_p7 }
  0x4e   : > { %p1374_p5 = pneg %p1373_p3 }
  0x4f   : > { %p1380_p2 = por %p1379_p1, %p1378_p12 }
  0x51   : > { %p1381_p4 = pnand %p1380_p2, %p1374_p5 }
  0x53   : > { %1384 = shalt.err (!%p1381_p4)
}
  0x54   : > { %s1385_s23 = scalar_lea.vmem %s1638_s29, 384  ;;  %s1478_s21 = smov [#allocation2]  }
  0x55   : > { %p1386_p6 = scmp.ne.s32.totalorder %s1638_s29, %s1385_s23  ;;  %s1390_s27 = sshll.u32 %s1478_s21, 4  ;;  %s1391_s27 = int_to_ptr.vmem [resolvable:$false] %s1390_s27 }
  0x56   : > { %s1392_s22 = scalar_lea.vmem %s1391_s27, 768  ;;  %p1393_p3 = scmp.lt.s32.totalorder %s1638_s29, %s1391_s27 }
  0x57   : > { %p1388_p11 = pnand %p1386_p6, %p1372_p0  ;;  %p1394_p7 = scmp.lt.s32.totalorder %s1392_s22, %s1385_s23 }
  0x59   : > { %p1389_p13 = pneg %p1388_p11  ;;  %p1395_p9 = por %p1394_p7, %p1393_p3 }
  0x5b   : > { %p1396_p12 = pnand %p1395_p9, %p1389_p13 }
  0x5d   : > { %1399 = shalt.err (!%p1396_p12)
}
  0x5e   : > { %1242 = dma.hbm_to_vmem [thread:$0]  (!%p1629_p10), %s1636_s28, 384, %s1638_s29, %s1640_s30, %s1474_s7, %s1474_s7, %s1475_s8  }
  0x5f   : > { %p1849_p0 = scmp.ne.s32.totalorder %s1844_s20, 0 }
  0x60   : > { %s1674_s4 = sand.u32 (!%p1849_p0), 1, %s1462_s13   ;;  %p1850_p5 = scmp.ne.s32.totalorder (!%p1849_p0), %s1842_s18, 0 }
  0x61   : > { %181 = sbr.rel (%p1849_p0) target bundleno = 2227 (0x8b3), region = 32  ;;  %s184_s9 = scalar_lea.sflag (!%p1849_p0), [#allocation3], %s1674_s4 }
  0x62   : > { %s1218_s5 = smul.u32 (!%p1849_p0), 24, %s1674_s4 }
  0x64   : > { %s1680_s24 = scalar_lea.vmem (!%p1849_p0), [#allocation2], %s1218_s5 }
  0x68   : > { %1445 = dma.done.wait (%p1850_p5), %s184_s9, 384  }
  0x69   : > { %1447 = vsyncadd (%p1850_p5), %s184_s9, 4294966912  ;;  %p1851_p10 = scmp.eq.s32.totalorder %s1525_s16, 0 }
  0x6b   : > { %1449 = dma.done.wait (%p1851_p10), [#allocation6], 3712   ;;  %p1852_p1 = pmov %p1851_p10 }
  0x6c   : > { %v1479_v0 = vmov 0.0   ;;  %vm1480_vm0 = vmmov 0   ;;  %v1295_v1 = vld [vmem:[%s1680_s24 + $0x8] sm:$0xff]   ;;  %v1698_v2 = vld [vmem:[%s1680_s24] sm:$0xff]   ;;  %vm235_vm1 = vcmask 130048   ;;  %vm288_vm2 = vcmask 1043456  }
  0x6d   : > { %1451 = vsyncadd (%p1852_p1), [#allocation6], 4294963584  ;;  %1138 = vmatprep.subr.bf16.mxu0 %v1479_v0  ;;  %1140 = vmatprep.mubr.msk.bf16.mxu0 %vm1480_vm0, %v1479_v0  ;;  %v281_v3 = vld [vmem:[#allocation5] sm:$0xf]  ;;  %vm284_vm3 = vcmask 64512   ;;  %v1297_v10 = vld [vmem:[#allocation5 + $0x8] sm:$0xff]   ;;  %v418_v53 = vlaneseq }
  0x6e   : > { %1144 = vmatprep.subr.bf16.mxu1 %v1479_v0  ;;  %1146 = vmatprep.mubr.msk.bf16.mxu1 %vm1480_vm0, %v1479_v0  ;;  %v290_v4 = vsel %vm288_vm2, %v281_v3, 0  ;;  %v282_v11 = vld [vmem:[#allocation7] sm:$0xff]  ;;  %v283_v13 = vld [vmem:[#allocation7 + $0x8] sm:$0xff]  ;;  %v338_v22 = vld [vmem:[#allocation7 + $0x10] sm:$0xff]  ;;  %vm689_vm4 = vcmask 261120   ;;  %vm770_vm9 = vcmask 523264  }
  0x6f   : > { %1139 = vmatpush3.bf16.msra.mxu0 %v1295_v1  ;;  %1145 = vmatpush3.bf16.msra.mxu1 %v290_v4  ;;  %v339_v24 = vld [vmem:[#allocation7 + $0x18] sm:$0xff]  ;;  %v1713_v54 = vshrl.u32 %v418_v53, 7  ;;  %v392_v55 = vld [vmem:[#allocation7 + $0x70] sm:$0x1]  ;;  %v1085_v60 = vld [vmem:[#allocation7 + $0x71] ss:$0 sm:$0xff] }
  0x70   : > { %1150 = vmatprep.subr.bf16.mxu0 %v1479_v0  ;;  %1156 = vmatprep.subr.bf16.mxu1 %v1479_v0  ;;  %v1298_v4 = vld [vmem:[#allocation5 + $0x10] sm:$0xff]   ;;  %s217_s18 = scalar_lea.vmem [#allocation8], %s1218_s5  ;;  %s1219_s7 = smul.u32 384, %s1525_s16 }
  0x71   : > { %v420_v56 = vsub.s32 0, %v1713_v54  ;;  %v1301_v54 = vld [vmem:[#allocation5 + $0x28] sm:$0xff]   ;;  %s978_s20 = sshll.u32 %s217_s18, 4  ;;  %s965_s16 = scalar_lea.sflag [#allocation4], %s1674_s4  ;;  %s1785_s20 = int_to_ptr.vmem [resolvable:$true] %s978_s20 }
  0x72   : > { %1141 = vmatmul.mubr.msk.bf16.vlgmr.msra.gmra.mrb[0].mxu0 %vm235_vm1, %v1698_v2  ;;  %s1792_s29 = scalar_lea.hbm %s1838_s3, %s1219_s7  ;;  %s1400_s30 = scalar_lea.vmem %s1785_s20, 384 }
  0x73   : > { %1152 = vmatprep.mubr.msk.bf16.mxu0 %vm1480_vm0, %v1479_v0  ;;  %1151 = vmatpush3.bf16.msra.mxu0 %v1297_v10  ;;  %v1299_v10 = vld [vmem:[#allocation5 + $0x18] sm:$0xff]   ;;  %p1401_p2 = scmp.ne.s32.totalorder %s1785_s20, %s1400_s30  ;;  %s1481_s10 = smov [#allocation8]  }
  0x74   : > { %1162 = vmatprep.subr.bf16.mxu0 %v1479_v0  ;;  %s1404_s25 = sshll.u32 %s1481_s10, 4  ;;  %s1405_s25 = int_to_ptr.vmem [resolvable:$false] %s1404_s25 }
  0x75   : > { %p1402_p4 = pnand %p1401_p2, %p1622_p8  ;;  %s1406_s26 = scalar_lea.vmem %s1405_s25, 768 }
  0x76   : > { %p1407_p11 = scmp.lt.s32.totalorder %s1785_s20, %s1405_s25  ;;  %p1408_p13 = scmp.lt.s32.totalorder %s1406_s26, %s1400_s30 }
  0x77   : > { %p1403_p6 = pneg %p1402_p4 }
  0x78   : > { %p1409_p3 = por %p1408_p13, %p1407_p11 }
  0x7a   : > { %p1410_p7 = pnand %p1409_p3, %p1403_p6 }
 0x145   : > { %v273_v5 = vpop.f32.mrb[0].mxu0 }
 0x146   : > { %v1142_v6 = vpop.f32.mrb[1].mxu0 }
 0x147   : > { %v276_v7 = vpop.f32.mrb[2].mxu0 }
 0x148   : > { %v280_v8 = vpack.c.bf16 %v276_v7, %v273_v5  ;;  %v1143_v9 = vpop.f32.mrb[3].mxu0 }
 0x14a   : > { %1147 = vmatmul.mubr.msk.bf16.vlgmr.msra.gmra.mrb[0].mxu1 %vm284_vm3, %v280_v8 }
 0x14b   : > { %1158 = vmatprep.mubr.msk.bf16.mxu1 %vm1480_vm0, %v1479_v0 }
 0x21d   : > { %v326_v12 = vpop.f32.mrb[0].mxu1 }
 0x21e   : > { %v327_v14 = vadd.f32 %v326_v12, %v282_v11  ;;  %v1148_v15 = vpop.f32.mrb[1].mxu1  ;;  %v476_v12 = vld [vmem:[#allocation7 + $0x28] sm:$0xff] }
 0x21f   : > { %v329_v16 = vpop.f32.mrb[2].mxu1 }
 0x220   : > { %v330_v17 = vadd.f32 %v329_v16, %v283_v13  ;;  %v1149_v18 = vpop.f32.mrb[3].mxu1  ;;  %v333_v19 = vmax.f32 %v327_v14, 0.0 }
 0x222   : > { %v334_v20 = vmax.f32 %v330_v17, 0.0 }
 0x224   : > { %v335_v21 = vpack.c.bf16 %v334_v20, %v333_v19 }
 0x226   : > { %1153 = vmatmul.mubr.msk.bf16.vlgmr.msra.gmra.mrb[4].mxu0 %vm235_vm1, %v335_v21  ;;  %v1300_v21 = vld [vmem:[#allocation5 + $0x20] sm:$0xff]  }
 0x227   : > { %1164 = vmatprep.mubr.msk.bf16.mxu0 %vm1480_vm0, %v1479_v0  ;;  %1163 = vmatpush3.bf16.msra.mxu0 %v1298_v4 }
 0x228   : > { %1174 = vmatprep.subr.bf16.mxu0 %v1479_v0 }
 0x2f9   : > { %v383_v23 = vpop.f32.mrb[4].mxu0 }
 0x2fa   : > { %v384_v25 = vadd.f32 %v383_v23, %v338_v22  ;;  %v1154_v26 = vpop.f32.mrb[5].mxu0  ;;  %v532_v22 = vld [vmem:[#allocation7 + $0x30] sm:$0xff] }
 0x2fb   : > { %v386_v27 = vpop.f32.mrb[6].mxu0 }
 0x2fc   : > { %v387_v28 = vadd.f32 %v386_v27, %v339_v24  ;;  %v1155_v29 = vpop.f32.mrb[7].mxu0  ;;  %v390_v30 = vmax.f32 %v384_v25, 0.0  ;;  %v533_v24 = vld [vmem:[#allocation7 + $0x38] sm:$0xff] }
 0x2fe   : > { %v391_v31 = vmax.f32 %v387_v28, 0.0 }
 0x300   : > { %v394_v32 = vadd.f32 %v391_v31, %v390_v30 }
 0x302   : > { %v395_v33 = vrot.slane %v394_v32, 4 }
 0x304   : > { %v396_v34 = vadd.f32 %v395_v33, %v394_v32 }
 0x306   : > { %v397_v35 = vrot.slane %v396_v34, 2 }
 0x308   : > { %v398_v36 = vadd.f32 %v397_v35, %v396_v34 }
 0x30a   : > { %v399_v37 = vrot.slane %v398_v36, 1 }
 0x30c   : > { %v400_v38 = vadd.f32 %v399_v37, %v398_v36 }
 0x30e   : > { %v402_v39 = vmul.f32 0.0625, %v400_v38 }
 0x310   : > { %v403_v40 = vsub.f32 %v390_v30, %v402_v39  ;;  %v404_v41 = vsub.f32 %v391_v31, %v402_v39 }
 0x312   : > { %v405_v42 = vmul.f32 %v403_v40, %v403_v40  ;;  %v406_v43 = vmul.f32 %v404_v41, %v404_v41 }
 0x314   : > { %v407_v44 = vadd.f32 %v406_v43, %v405_v42 }
 0x316   : > { %v408_v45 = vrot.slane %v407_v44, 4 }
 0x318   : > { %v409_v46 = vadd.f32 %v408_v45, %v407_v44 }
 0x31a   : > { %v410_v47 = vrot.slane %v409_v46, 2 }
 0x31c   : > { %v411_v48 = vadd.f32 %v410_v47, %v409_v46 }
 0x31e   : > { %v412_v49 = vrot.slane %v411_v48, 1 }
 0x320   : > { %v413_v50 = vadd.f32 %v412_v49, %v411_v48 }
 0x322   : > { %v414_v51 = vmul.f32 0.0625, %v413_v50 }
 0x324   : > { %v415_v52 = vadd.f32 1e-05, %v414_v51 }
 0x326   : > { %1310 = vrsqrt.f32 %v415_v52 }
 0x330   : > { %v1311_v57 = vpop.eup %1310 }
 0x331   : > { %v417_v58 = vmul.f32 %v1311_v57, %v392_v55  ;;  %v586_v55 = vld [vmem:[#allocation7 + $0x72] sm:$0x1] }
 0x333   : > { %v421_v59 = vrot.slane %v417_v58, %v420_v56 }
 0x335   : > { %v422_v61 = vmul.f32 %v421_v59, %v403_v40  ;;  %v423_v62 = vmul.f32 %v421_v59, %v404_v41 }
 0x337   : > { %v1718_v63 = vadd.f32 %v1085_v60, %v422_v61  ;;  %v1720_v1 = vadd.f32 %v1085_v60, %v423_v62  ;;  %v1091_v60 = vld [vmem:[#allocation7 + $0x73] ss:$0 sm:$0xff] }
 0x339   : > { %v430_v3 = vpack.c.bf16 %v1720_v1, %v1718_v63 }
 0x33b   : > { %1157 = vmatpush3.bf16.msra.mxu1 %v430_v3 }
 0x33c   : > { %1168 = vmatprep.subr.bf16.mxu1 %v1479_v0 }
 0x33e   : > { %1159 = vmatmul.mubr.msk.bf16.vlgmr.msra.gmra.mrb[4].mxu1 %vm235_vm1, %v1698_v2  ;;  %v475_v2 = vld [vmem:[#allocation7 + $0x20] sm:$0xff] }
 0x33f   : > { %1170 = vmatprep.mubr.msk.bf16.mxu1 %vm1480_vm0, %v1479_v0  ;;  %1169 = vmatpush3.bf16.msra.mxu1 %v1299_v10 }
 0x340   : > { %1180 = vmatprep.subr.bf16.mxu1 %v1479_v0 }
 0x411   : > { %v465_v5 = vpop.f32.mrb[4].mxu1 }
 0x412   : > { %v1160_v6 = vpop.f32.mrb[5].mxu1 }
 0x413   : > { %v468_v7 = vpop.f32.mrb[6].mxu1 }
 0x414   : > { %v472_v8 = vpack.c.bf16 %v468_v7, %v465_v5  ;;  %v1161_v9 = vpop.f32.mrb[7].mxu1 }
 0x415   : > { %v1305_v9 = vld [vmem:[#allocation5 + $0x38] sm:$0xff]  }
 0x416   : > { %1165 = vmatmul.mubr.msk.bf16.vlgmr.msra.gmra.mrb[8].mxu0 %vm235_vm1, %v472_v8  ;;  %v223_v8 = vld [vmem:[%s1680_s24 + $0x10] sm:$0xf] }
 0x417   : > { %1176 = vmatprep.mubr.msk.bf16.mxu0 %vm1480_vm0, %v1479_v0 }
 0x4e9   : > { %v520_v11 = vpop.f32.mrb[8].mxu0 }
 0x4ea   : > { %v521_v13 = vadd.f32 %v520_v11, %v475_v2  ;;  %v1166_v14 = vpop.f32.mrb[9].mxu0 }
 0x4eb   : > { %v523_v15 = vpop.f32.mrb[10].mxu0  ;;  %v1306_v14 = vld [vmem:[#allocation5 + $0x40] sm:$0xff]  }
 0x4ec   : > { %v524_v16 = vadd.f32 %v523_v15, %v476_v12  ;;  %v1167_v17 = vpop.f32.mrb[11].mxu0  ;;  %v527_v18 = vmax.f32 %v521_v13, 0.0  ;;  %v1303_v13 = vld [vmem:[#allocation5 + $0x58] sm:$0xff]   ;;  %v1307_v15 = vld [vmem:[#allocation5 + $0x48] sm:$0xff]  }
 0x4ed   : > { %v1309_v17 = vld [vmem:[#allocation5 + $0x68] sm:$0xff]  }
 0x4ee   : > { %v528_v19 = vmax.f32 %v524_v16, 0.0  ;;  %v1308_v16 = vld [vmem:[#allocation5 + $0x60] sm:$0xff]  }
 0x4f0   : > { %v529_v20 = vpack.c.bf16 %v528_v19, %v527_v18  ;;  %v670_v18 = vand.u32 127, %v418_v53  ;;  %v676_v19 = vld [vmem:[#allocation7 + $0x40] sm:$0xff] }
 0x4f2   : > { %1171 = vmatmul.mubr.msk.bf16.vlgmr.msra.gmra.mrb[8].mxu1 %vm235_vm1, %v529_v20  ;;  %vm814_vm5 = vcmp.ge.s32.totalorder %v670_v18, 64  ;;  %vm815_vm6 = vcmp.lt.s32.totalorder %v670_v18, 96  ;;  %vm733_vm7 = vcmp.lt.s32.totalorder %v670_v18, 64  ;;  %vm951_vm10 = vcmp.ge.s32.totalorder %v670_v18, 32 }
 0x4f3   : > { %1184 = vmatprep.mubr.msk.bf16.mxu1 %vm1480_vm0, %v1479_v0  ;;  %1181 = vmatpush3.bf16.msra.mxu1 %v1300_v21  ;;  %vm1761_vm8 = vmand %vm814_vm5, %vm815_vm6  ;;  %vm883_vm11 = vcmp.lt.s32.totalorder %v670_v18, 32 }
 0x4f4   : > { %1182 = vmatprep.subr.bf16.mxu1 %v1479_v0  ;;  %vm1769_vm12 = vmand %vm951_vm10, %vm733_vm7 }
 0x4f7   : > { %1183 = vmatpush3.bf16.msra.mxu1 %v1301_v54 }
 0x4f8   : > { %1200 = vmatprep.subr.bf16.mxu1 %v1479_v0 }
 0x5c5   : > { %v577_v23 = vpop.f32.mrb[8].mxu1 }
 0x5c6   : > { %v578_v25 = vadd.f32 %v577_v23, %v532_v22  ;;  %v1172_v26 = vpop.f32.mrb[9].mxu1 }
 0x5c7   : > { %v580_v27 = vpop.f32.mrb[10].mxu1 }
 0x5c8   : > { %v581_v28 = vadd.f32 %v580_v27, %v533_v24  ;;  %v1173_v29 = vpop.f32.mrb[11].mxu1  ;;  %v584_v30 = vmax.f32 %v578_v25, 0.0 }
 0x5ca   : > { %v585_v31 = vmax.f32 %v581_v28, 0.0  ;;  %v825_v28 = vld [vmem:[#allocation7 + $0x50] sm:$0xff] }
 0x5cc   : > { %v588_v32 = vadd.f32 %v585_v31, %v584_v30 }
 0x5ce   : > { %v589_v33 = vrot.slane %v588_v32, 4 }
 0x5d0   : > { %v590_v34 = vadd.f32 %v589_v33, %v588_v32 }
 0x5d2   : > { %v591_v35 = vrot.slane %v590_v34, 2 }
 0x5d4   : > { %v592_v36 = vadd.f32 %v591_v35, %v590_v34 }
 0x5d6   : > { %v593_v37 = vrot.slane %v592_v36, 1 }
 0x5d8   : > { %v594_v38 = vadd.f32 %v593_v37, %v592_v36 }
 0x5da   : > { %v595_v39 = vmul.f32 0.0625, %v594_v38 }
 0x5dc   : > { %v596_v40 = vsub.f32 %v584_v30, %v595_v39  ;;  %v597_v41 = vsub.f32 %v585_v31, %v595_v39  ;;  %v826_v30 = vld [vmem:[#allocation7 + $0x58] sm:$0xff] }
 0x5de   : > { %v598_v42 = vmul.f32 %v596_v40, %v596_v40  ;;  %v599_v43 = vmul.f32 %v597_v41, %v597_v41 }
 0x5e0   : > { %v600_v44 = vadd.f32 %v599_v43, %v598_v42 }
 0x5e2   : > { %v601_v45 = vrot.slane %v600_v44, 4 }
 0x5e4   : > { %v602_v46 = vadd.f32 %v601_v45, %v600_v44  ;;  %v745_v44 = vld [vmem:[#allocation7 + $0x48] sm:$0xff] }
 0x5e6   : > { %v603_v47 = vrot.slane %v602_v46, 2 }
 0x5e8   : > { %v604_v48 = vadd.f32 %v603_v47, %v602_v46 }
 0x5ea   : > { %v605_v49 = vrot.slane %v604_v48, 1 }
 0x5ec   : > { %v606_v50 = vadd.f32 %v605_v49, %v604_v48 }
 0x5ee   : > { %v607_v51 = vmul.f32 0.0625, %v606_v50 }
 0x5f0   : > { %v608_v52 = vadd.f32 1e-05, %v607_v51 }
 0x5f2   : > { %1312 = vrsqrt.f32 %v608_v52 }
 0x5fc   : > { %v1313_v57 = vpop.eup %1312 }
 0x5fd   : > { %v610_v58 = vmul.f32 %v1313_v57, %v586_v55  ;;  %v893_v55 = vld [vmem:[#allocation7 + $0x60] sm:$0xff] }
 0x5ff   : > { %v614_v59 = vrot.slane %v610_v58, %v420_v56  ;;  %v1304_v56 = vld [vmem:[#allocation5 + $0x30] sm:$0xff]   ;;  %v894_v58 = vld [vmem:[#allocation7 + $0x68] sm:$0xff] }
 0x601   : > { %v615_v61 = vmul.f32 %v614_v59, %v596_v40  ;;  %v616_v62 = vmul.f32 %v614_v59, %v597_v41 }
 0x603   : > { %v621_v3 = vadd.f32 %v1091_v60, %v615_v61  ;;  %v622_v4 = vadd.f32 %v1091_v60, %v616_v62 }
 0x605   : > { %v624_v5 = vadd.f32 %v622_v4, %v1720_v1  ;;  %v623_v6 = vadd.f32 %v621_v3, %v1718_v63  ;;  %v1302_v1 = vld [vmem:[#allocation5 + $0x50] sm:$0xff]  }
 0x607   : > { %v625_v7 = vpack.c.bf16 %v624_v5, %v623_v6 }
 0x609   : > { %1175 = vmatpush3.bf16.msra.mxu0 %v625_v7 }
 0x60a   : > { %1188 = vmatprep.subr.bf16.mxu0 %v1479_v0 }
 0x60c   : > { %1177 = vmatmul.mubr.msk.bf16.vlgmr.msra.gmra.mrb[12].mxu0 %vm235_vm1, %v223_v8 }
 0x60d   : > { %1196 = vmatprep.mubr.msk.bf16.mxu0 %vm1480_vm0, %v1479_v0  ;;  %1189 = vmatpush3.bf16.msra.mxu0 %v1304_v56 }
 0x60e   : > { %1190 = vmatprep.subr.bf16.mxu0 %v1479_v0 }
 0x611   : > { %1191 = vmatpush3.bf16.msra.mxu0 %v1305_v9 }
 0x612   : > { %1192 = vmatprep.subr.bf16.mxu0 %v1479_v0 }
 0x615   : > { %1193 = vmatpush3.bf16.msra.mxu0 %v1306_v14 }
 0x616   : > { %1194 = vmatprep.subr.bf16.mxu0 %v1479_v0 }
 0x619   : > { %1195 = vmatpush3.bf16.msra.mxu0 %v1307_v15 }
 0x6df   : > { %v663_v63 = vpop.f32.mrb[12].mxu0 }
 0x6e0   : > { %v671_v10 = vpack.c.bf16 %v663_v63, %v663_v63  ;;  %v1178_v2 = vpop.f32.mrb[13].mxu0 }
 0x6e1   : > { %v666_v11 = vpop.f32.mrb[14].mxu0 }
 0x6e2   : > { %1185 = vmatmul.mubr.msk.bf16.vlgmr.msra.gmra.mrb[12].mxu1 %vm689_vm4, %v671_v10  ;;  %v1179_v12 = vpop.f32.mrb[15].mxu0 }
 0x6e3   : > { %1201 = vmatpush3.bf16.msra.mxu1 %v1302_v1  ;;  %1204 = vmatprep.mubr.msk.bf16.mxu1 %vm1480_vm0, %v1479_v0 }
 0x6e4   : > { %1202 = vmatprep.subr.bf16.mxu1 %v1479_v0 }
 0x6e7   : > { %1203 = vmatpush3.bf16.msra.mxu1 %v1303_v13 }
 0x6e8   : > { %1208 = vmatprep.subr.bf16.mxu1 %v1479_v0 }
 0x6ea   : > { %1205 = vmatmul.mubr.msk.bf16.vlgmr.msra.gmra.mrb[16].mxu1 %vm689_vm4, %v625_v7 }
 0x6eb   : > { %1212 = vmatprep.mubr.msk.bf16.mxu1 %vm1480_vm0, %v1479_v0  ;;  %1209 = vmatpush3.bf16.msra.mxu1 %v1308_v16 }
 0x6ec   : > { %1210 = vmatprep.subr.bf16.mxu1 %v1479_v0 }
 0x6ef   : > { %1211 = vmatpush3.bf16.msra.mxu1 %v1309_v17 }
 0x7b5   : > { %v727_v20 = vpop.f32.mrb[12].mxu1 }
 0x7b6   : > { %v728_v21 = vadd.f32 %v727_v20, %v676_v19  ;;  %v1186_v22 = vpop.f32.mrb[13].mxu1 }
 0x7b7   : > { %v730_v23 = vpop.f32.mrb[14].mxu1 }
 0x7b8   : > { %v734_v24 = vmax.f32 %v728_v21, 0.0  ;;  %v1187_v26 = vpop.f32.mrb[15].mxu1 }
 0x7ba   : > { %v735_v0 = vsel %vm733_vm7, %v734_v24, %v728_v21 }
 0x7bb   : > { %v736_v27 = vpack.c.bf16 %v735_v0, %v735_v0  ;;  %v819_v53 = vsel %vm1761_vm8, %v735_v0, 0.0 }
 0x7bd   : > { %1197 = vmatmul.mubr.msk.bf16.vlgmr.msra.gmra.mrb[16].mxu0 %vm770_vm9, %v736_v27  ;;  %v876_v29 = vpop.f32.mrb[16].mxu1 }
 0x7be   : > { %v877_v31 = vadd.f32 %v876_v29, %v825_v28  ;;  %v1206_v32 = vpop.f32.mrb[17].mxu1 }
 0x7bf   : > { %v879_v33 = vpop.f32.mrb[18].mxu1 }
 0x7c0   : > { %v884_v35 = vmax.f32 %v877_v31, 0.0  ;;  %v880_v36 = vadd.f32 %v879_v33, %v826_v30  ;;  %v1207_v37 = vpop.f32.mrb[19].mxu1 }
 0x7c2   : > { %v886_v38 = vsel %vm883_vm11, %v884_v35, %v877_v31  ;;  %v885_v39 = vmax.f32 %v880_v36, 0.0 }
 0x7c3   : > { %v957_v40 = vsel %vm1769_vm12, %v886_v38, 0.0 }
 0x7c4   : > { %v887_v41 = vsel %vm883_vm11, %v885_v39, %v880_v36 }
 0x7c5   : > { %v888_v42 = vpack.c.bf16 %v887_v41, %v886_v38  ;;  %v958_v43 = vsel %vm1769_vm12, %v887_v41, 0.0 }
 0x7c7   : > { %1213 = vmatmul.mubr.msk.bf16.vlgmr.msra.gmra.mrb[20].mxu1 %vm689_vm4, %v888_v42 }
 0x890   : > { %v808_v45 = vpop.f32.mrb[16].mxu0 }
 0x891   : > { %v809_v46 = vadd.f32 %v808_v45, %v745_v44  ;;  %v1198_v47 = vpop.f32.mrb[17].mxu0 }
 0x892   : > { %v811_v48 = vpop.f32.mrb[18].mxu0 }
 0x893   : > { %v817_v49 = vmax.f32 %v809_v46, 0.0  ;;  %v1199_v50 = vpop.f32.mrb[19].mxu0 }
 0x895   : > { %v818_v51 = vsel %vm1761_vm8, %v817_v49, %v809_v46 }
 0x896   : > { %v820_v52 = vadd.f32 %v819_v53, %v818_v51 }
 0x898   : > { %961 = vst [vmem:[%s217_s18] sm:$0xff] %v820_v52 }
 0x89a   : > { %v944_v57 = vpop.f32.mrb[20].mxu1 }
 0x89b   : > { %v945_v59 = vadd.f32 %v944_v57, %v893_v55  ;;  %v1214_v60 = vpop.f32.mrb[21].mxu1 }
 0x89c   : > { %v947_v61 = vpop.f32.mrb[22].mxu1 }
 0x89d   : > { %v953_v62 = vmax.f32 %v945_v59, 0.0  ;;  %v948_v3 = vadd.f32 %v947_v61, %v894_v58  ;;  %v1215_v4 = vpop.f32.mrb[23].mxu1 }
 0x89f   : > { %v955_v5 = vsel %vm1769_vm12, %v953_v62, %v945_v59  ;;  %v954_v6 = vmax.f32 %v948_v3, 0.0 }
 0x8a0   : > { %v959_v7 = vadd.f32 %v957_v40, %v955_v5 }
 0x8a1   : > { %v956_v8 = vsel %vm1769_vm12, %v954_v6, %v948_v3 }
 0x8a2   : > { %962 = vst [vmem:[%s217_s18 + $0x8] sm:$0xff] %v959_v7  ;;  %v960_v54 = vadd.f32 %v958_v43, %v956_v8 }
 0x8a4   : > { %963 = vst [vmem:[%s217_s18 + $0x10] sm:$0xff] %v960_v54 }
 0x8a5   : > { %1413 = shalt.err (!%p1410_p7)
}
 0x8a6   : > { %s1414_s23 = scalar_lea.hbm %s1792_s29, 384  ;;  %s1418_s22 = scalar_lea.hbm %s1838_s3, 3072 }
 0x8a7   : > { %p1415_p9 = scmp.ne.s32.totalorder %s1792_s29, %s1414_s23  ;;  %p1419_p5 = scmp.lt.u32.totalorder %s1792_s29, %s1838_s3 }
 0x8a8   : > { %p1420_p10 = scmp.lt.u32.totalorder %s1418_s22, %s1414_s23  ;;  %p1422_p2 = scmp.lt.u32.totalorder %s1414_s23, %s1792_s29 }
 0x8a9   : > { %p1416_p12 = pnand %p1415_p9, %p1622_p8 }
 0x8aa   : > { %p1421_p1 = por %p1420_p10, %p1419_p5 }
 0x8ab   : > { %p1417_p0 = pneg %p1416_p12 }
 0x8ac   : > { %p1423_p4 = por %p1422_p2, %p1421_p1 }
 0x8ae   : > { %p1424_p6 = pnand %p1423_p4, %p1417_p0 }
 0x8b0   : > { %1427 = shalt.err (!%p1424_p6)
}
 0x8b1   : > { %s1482_s24 = smov 128   ;;  %s1483_s18 = smov 8  }
 0x8b2   : > { %1230 = dma.vmem_to_hbm [thread:$0]  (%p1622_p8), %s1785_s20, 384, %s1792_s29, %s965_s16, %s1482_s24, %s1482_s24, %s1483_s18  }
 0x8b3 PF: > { %p1252_p11 = scmp.ge.s32.totalorder %s1470_s15, 2  ;;  %s993_s7 = sand.u32 1, %s1458_s12  }
 0x8b4   : > { %p1857_p13 = scmp.ne.s32.totalorder %s1843_s19, 0  ;;  %s994_s8 = scalar_lea.sflag [#allocation4], %s993_s7 }
 0x8b6   : > { %p1244_p3 = pnand %p1252_p11, %p1857_p13 }
 0x8b8   : > { %1453 = dma.done.wait (!%p1244_p3), %s994_s8, 384  }
 0x8b9   : > { %1455 = vsyncadd (!%p1244_p3), %s994_s8, 4294966912  ;;  %p17_p7 = scmp.ge.s32.totalorder %s1609_s6, 10   ;;  %s1858_s12 = smov %s1462_s13 }
 0x8ba   : > { %s1859_s13 = smov %s1466_s14  ;;  %s1860_s14 = smov %s1618_s11 }
 0x8bb   : > { %s1861_s15 = smov %s1609_s6  ;;  %19 = sbr.rel (!%p17_p7) target bundleno = 6 (0x6), region = 85 }
 0x8c2   :  { %999 = vsyncpa [#allocation3], 1 }
 0x8c3   :  { %1001 = vsyncpa [#allocation3 + $0x1], 1 }
 0x8c4   :  { %1002 = vsyncpa [#allocation6], 1 }
 0x8c5   :  { %1003 = vsyncpa [#allocation4], 1 }
 0x8c6   :  { %1005 = vsyncpa [#allocation4 + $0x1], 1 }

</bundles_post_ra>
